<compile_context>
chip_gen: v7x
topology: tpu7x:2x2x1
jax: 0.10.0
libtpu: 0.0.40
codegen_flags: <defaults>
</compile_context>

<pallas_src>
import functools

import jax
import jax.numpy as jnp
from jax import lax
from jax.experimental import pallas as pl
from jax.experimental.pallas import tpu as pltpu


N_LAYERS = 10  # 10 linear layers per branch (ReLU on the first 9)


def _round_up(x, m):
    return ((x + m - 1) // m) * m


# ----------------------------------------------------------------------------
# Kernel: single fused 10-layer MLP chain on a (TILE_B, D) activation tile.
# ----------------------------------------------------------------------------
def actor_fused_kernel(x_ref, w_ref, b_ref, out_ref, *, output_size, k_in):
    """x_ref: (TILE_B, k_in) f32; w_ref: (N_LAYERS, D, D) bf16;
    b_ref: (N_LAYERS, 1, D) f32; out_ref: (TILE_B, D) f32.
    Columns [0, output_size) hold mean, [output_size, 2*output_size) hold cov
    (= exp of the final linear)."""
    # Layer 0: contract only over the real input lanes (k_in << D).
    h = x_ref[...].astype(jnp.bfloat16)                 # (TILE_B, k_in)
    w0 = w_ref[0][:k_in, :]                             # (k_in, D) bf16
    z = jnp.dot(h, w0, preferred_element_type=jnp.float32) + b_ref[0]
    h = jnp.maximum(z, 0.0)                             # f32

    # Layers 1..8: block-diagonal fused hidden layers (bf16 MXU, f32 acc).
    for i in range(1, N_LAYERS - 1):
        z = (jnp.dot(h.astype(jnp.bfloat16), w_ref[i],
                     preferred_element_type=jnp.float32) + b_ref[i])
        h = jnp.maximum(z, 0.0)

    # Final layer (no ReLU).
    z = (jnp.dot(h.astype(jnp.bfloat16), w_ref[N_LAYERS - 1],
                 preferred_element_type=jnp.float32) + b_ref[N_LAYERS - 1])

    # exp only on the cov lanes (mean / padded lanes pass through).
    col = lax.broadcasted_iota(jnp.int32, z.shape, 1)
    is_cov = (col >= output_size) & (col < 2 * output_size)
    out_ref[...] = jnp.where(is_cov, jnp.exp(z), z).astype(out_ref.dtype)


# ----------------------------------------------------------------------------
# Parameter packing: fuse mean/cov branches into block-diagonal slabs.
# ----------------------------------------------------------------------------
def build_fused_params(mean_ws, mean_bs, cov_ws, cov_bs):
    """Returns (W_slab bf16 (10,D,D), B_slab f32 (10,1,D)).  Zero padding is
    exact so the mean and cov halves never bleed into each other."""
    input_size, hidden = mean_ws[0].shape
    half = cov_ws[0].shape[1]
    output_size = mean_ws[-1].shape[1]
    fused = hidden + half
    D = _round_up(max(input_size, fused, 2 * output_size), 128)

    W = jnp.zeros((N_LAYERS, D, D), jnp.float32)
    B = jnp.zeros((N_LAYERS, 1, D), jnp.float32)

    # Layer 0: shared input, outputs concatenated along lanes.
    W = W.at[0, :input_size, :hidden].set(mean_ws[0])
    W = W.at[0, :input_size, hidden:fused].set(cov_ws[0])
    B = B.at[0, :, :hidden].set(mean_bs[0])
    B = B.at[0, :, hidden:fused].set(cov_bs[0])

    # Layers 1..8: block diagonal.
    for i in range(1, N_LAYERS - 1):
        W = W.at[i, :hidden, :hidden].set(mean_ws[i])
        W = W.at[i, hidden:fused, hidden:fused].set(cov_ws[i])
        B = B.at[i, :, :hidden].set(mean_bs[i])
        B = B.at[i, :, hidden:fused].set(cov_bs[i])

    # Final layer: block diagonal into [mean | cov] output lanes.
    W = W.at[N_LAYERS - 1, :hidden, :output_size].set(mean_ws[-1])
    W = W.at[N_LAYERS - 1, hidden:fused, output_size:2 * output_size].set(cov_ws[-1])
    B = B.at[N_LAYERS - 1, :, :output_size].set(mean_bs[-1])
    B = B.at[N_LAYERS - 1, :, output_size:2 * output_size].set(cov_bs[-1])

    # Weights in bf16 (halves the dominant DMA); biases stay f32.
    return W.astype(jnp.bfloat16), B


# ----------------------------------------------------------------------------
# Forward wrapper.
# ----------------------------------------------------------------------------
@functools.partial(jax.jit, static_argnames=("output_size", "hidden_dim"))
def actor_continue_fc_forward(state, w_slab, b_slab, *, output_size, hidden_dim):
    batch, input_size = state.shape
    D = w_slab.shape[-1]
    k_in = _round_up(input_size, 8)

    # Batch tiling:
    #   batch <= 16 : single small tile (latency-bound regime).
    #   batch  > 16 : split into >= 2 "parallel" grid steps (keeps both v7x
    #                 TensorCores busy), tiles capped at 512 rows.
    if batch <= 16:
        tile_b = _round_up(batch, 8)
    else:
        tile_b = min(512, _round_up((batch + 1) // 2, 8))
    batch_pad = _round_up(batch, tile_b)

    x = state.astype(jnp.float32)
    if batch_pad != batch or k_in != input_size:
        x = jnp.pad(x, ((0, batch_pad - batch), (0, k_in - input_size)))

    # Cost estimate from TRUE (unpadded, block-diagonal) dimensions.
    half = hidden_dim // 2
    fused = hidden_dim + half
    true_flops = 2 * batch * (input_size * fused
                              + 8 * (hidden_dim * hidden_dim + half * half)
                              + fused * output_size)
    bytes_accessed = (w_slab.size * w_slab.dtype.itemsize
                      + b_slab.size * b_slab.dtype.itemsize
                      + batch * input_size * 4
                      + batch * 2 * output_size * 4)
    cost = pl.CostEstimate(
        flops=true_flops,
        transcendentals=batch * output_size,
        bytes_accessed=bytes_accessed,
    )

    fused_out = pl.pallas_call(
        functools.partial(actor_fused_kernel, output_size=output_size, k_in=k_in),
        out_shape=jax.ShapeDtypeStruct((batch_pad, D), jnp.float32),
        grid_spec=pltpu.PrefetchScalarGridSpec(
            num_scalar_prefetch=0,
            grid=(batch_pad // tile_b,),
            in_specs=[
                pl.BlockSpec((tile_b, k_in), lambda i: (i, 0)),
                pl.BlockSpec((N_LAYERS, D, D), lambda i: (0, 0, 0)),
                pl.BlockSpec((N_LAYERS, 1, D), lambda i: (0, 0, 0)),
            ],
            out_specs=pl.BlockSpec((tile_b, D), lambda i: (i, 0)),
        ),
        compiler_params=pltpu.CompilerParams(
            dimension_semantics=("parallel",)),
        cost_estimate=cost,
    )(x, w_slab, b_slab)

    # TODO(synk): for small-batch repeated inference, the remaining floor is
    # the per-call weight-slab DMA; a cross-pallas_call prefetch (P10) could
    # hide it but is not implemented here.
    mean = fused_out[:batch, :output_size]
    cov = fused_out[:batch, output_size:2 * output_size]
    return mean, cov


# ----------------------------------------------------------------------------
# Init (orthogonal weights as in __init__, PyTorch-default uniform biases).
# ----------------------------------------------------------------------------
def init_params(key, input_size, output_size, hidden_dim):
    ortho = jax.nn.initializers.orthogonal()

    def make_branch(key, sizes):
        ws, bs = [], []
        for i in range(len(sizes) - 1):
            key, kw, kb = jax.random.split(key, 3)
            fan_in, fan_out = sizes[i], sizes[i + 1]
            w = ortho(kw, (fan_in, fan_out), jnp.float32)  # stored (in, out)
            bound = 1.0 / jnp.sqrt(fan_in)
            b = jax.random.uniform(kb, (1, fan_out), jnp.float32, -bound, bound)
            ws.append(w)
            bs.append(b)
        return key, ws, bs

    half = hidden_dim // 2
    mean_sizes = [input_size] + [hidden_dim] * 9 + [output_size]
    cov_sizes = [input_size] + [half] * 9 + [output_size]
    key, mean_ws, mean_bs = make_branch(key, mean_sizes)
    key, cov_ws, cov_bs = make_branch(key, cov_sizes)
    return mean_ws, mean_bs, cov_ws, cov_bs


# Exact-semantics f32 reference (mirrors the PyTorch forward).
def reference_forward(state, mean_ws, mean_bs, cov_ws, cov_bs):
    h = state
    for i in range(N_LAYERS - 1):
        h = jnp.maximum(h @ mean_ws[i] + mean_bs[i], 0.0)
    mean = h @ mean_ws[-1] + mean_bs[-1]
    h = state
    for i in range(N_LAYERS - 1):
        h = jnp.maximum(h @ cov_ws[i] + cov_bs[i], 0.0)
    cov = jnp.exp(h @ cov_ws[-1] + cov_bs[-1])
    return mean, cov


# Reference with the same bf16-weight / f32-accumulate precision path as the
# kernel, for a tight correctness check.
def reference_forward_bf16(state, mean_ws, mean_bs, cov_ws, cov_bs):
    def branch(ws, bs, final_exp):
        h = state.astype(jnp.float32)
        for i in range(N_LAYERS - 1):
            z = jnp.dot(h.astype(jnp.bfloat16), ws[i].astype(jnp.bfloat16),
                        preferred_element_type=jnp.float32) + bs[i]
            h = jnp.maximum(z, 0.0)
        z = jnp.dot(h.astype(jnp.bfloat16), ws[-1].astype(jnp.bfloat16),
                    preferred_element_type=jnp.float32) + bs[-1]
        return jnp.exp(z) if final_exp else z

    return (branch(mean_ws, mean_bs, False), branch(cov_ws, cov_bs, True))


if __name__ == "__main__":
    # Small shapes consistent with the module: state is (batch, input_size).
    batch, input_size, output_size, hidden_dim = 8, 16, 4, 32
    # action_scale only affects gen_action / log_prob (not forward).
    # TODO(synk): gen_action's Normal sampling + tanh-squash log-prob
    # (get_norm_log_prob) is host-side glue, not kernelized.

    key = jax.random.PRNGKey(0)
    key, k_state = jax.random.split(key)
    state = jax.random.normal(k_state, (batch, input_size), jnp.float32)

    mean_ws, mean_bs, cov_ws, cov_bs = init_params(
        key, input_size, output_size, hidden_dim)

    # Pack once (outside the per-call path).
    w_slab, b_slab = build_fused_params(mean_ws, mean_bs, cov_ws, cov_bs)
    w_slab, b_slab = jax.block_until_ready((w_slab, b_slab))

    mean, cov = actor_continue_fc_forward(
        state, w_slab, b_slab, output_size=output_size, hidden_dim=hidden_dim)
    jax.block_until_ready((mean, cov))

    ref_mean, ref_cov = reference_forward(state, mean_ws, mean_bs, cov_ws, cov_bs)
    bf_mean, bf_cov = reference_forward_bf16(state, mean_ws, mean_bs, cov_ws, cov_bs)

    assert mean.shape == (batch, output_size) and cov.shape == (batch, output_size)
    # Tight check vs. same-precision (bf16 weights, f32 accumulate) reference.
    assert jnp.allclose(mean, bf_mean, atol=5e-3, rtol=5e-3)
    assert jnp.allclose(cov, bf_cov, atol=5e-3, rtol=5e-3)
    # Semantic check vs. full-f32 reference (bf16 weights drift slightly).
    assert jnp.allclose(mean, ref_mean, atol=5e-2, rtol=5e-2)
    assert jnp.allclose(cov, ref_cov, atol=5e-2, rtol=5e-2)
    assert bool(jnp.all(cov > 0.0))

    print("KERNEL_OK")
</pallas_src>

<mosaic_0001>
module attributes {stable_mosaic.version = 11 : i64} {
  func.func @actor_fused_kernel(%arg0: i32, %arg1: memref<8x16xf32, #tpu.memory_space<vmem>>, %arg2: memref<10x128x128xbf16, #tpu.memory_space<vmem>>, %arg3: memref<10x1x128xf32, #tpu.memory_space<vmem>>, %arg4: memref<8x128xf32, #tpu.memory_space<vmem>>) attributes {dimension_semantics = [#tpu.dimension_semantics<parallel>], iteration_bounds = array<i64: 1>, scalar_prefetch = 0 : i64, scratch_operands = 0 : i64, tpu.core_type = #tpu.core_type<tc>, window_params = [{transform_indices = @transform_0, window_bounds = array<i64: 8, 16>}, {pipeline_mode = #tpu.pipeline_mode<synchronous>, transform_indices = @transform_1, window_bounds = array<i64: 10, 128, 128>}, {pipeline_mode = #tpu.pipeline_mode<synchronous>, transform_indices = @transform_2, window_bounds = array<i64: 10, 1, 128>}, {transform_indices = @transform_3, window_bounds = array<i64: 8, 128>}]} {
    %c0 = arith.constant 0 : index
    %c0_0 = arith.constant 0 : index
    %0 = vector.load %arg1[%c0, %c0_0] : memref<8x16xf32, #tpu.memory_space<vmem>>, vector<8x16xf32>
    %1 = arith.truncf %0 : vector<8x16xf32> to vector<8x16xbf16>
    %c0_1 = arith.constant 0 : index
    %c0_2 = arith.constant 0 : index
    %c0_3 = arith.constant 0 : index
    %2 = vector.load %arg2[%c0_1, %c0_2, %c0_3] : memref<10x128x128xbf16, #tpu.memory_space<vmem>>, vector<1x128x128xbf16>
    %3 = vector.shape_cast %2 : vector<1x128x128xbf16> to vector<128x128xbf16>
    %4 = vector.extract_strided_slice %3 {offsets = [0, 0], sizes = [16, 128], strides = [1, 1]} : vector<128x128xbf16> to vector<16x128xbf16>
    %cst = arith.constant dense<0.000000e+00> : vector<8x128xf32>
    %5 = tpu.matmul %1, %4, %cst {dimension_numbers = #tpu.dot_dimension_numbers<[1], [0], [0], [1], [0, 0, 1, 1], [], []>} : vector<8x16xbf16>, vector<16x128xbf16>, vector<8x128xf32> -> vector<8x128xf32>
    %c0_4 = arith.constant 0 : index
    %c0_5 = arith.constant 0 : index
    %c0_6 = arith.constant 0 : index
    %6 = vector.load %arg3[%c0_4, %c0_5, %c0_6] : memref<10x1x128xf32, #tpu.memory_space<vmem>>, vector<1x1x128xf32>
    %7 = vector.shape_cast %6 : vector<1x1x128xf32> to vector<1x128xf32>
    %8 = vector.broadcast %7 : vector<1x128xf32> to vector<8x128xf32>
    %9 = arith.addf %5, %8 : vector<8x128xf32>
    %cst_7 = arith.constant 0.000000e+00 : f32
    %10 = vector.broadcast %cst_7 : f32 to vector<8x128xf32>
    %11 = arith.maximumf %9, %10 : vector<8x128xf32>
    %12 = arith.truncf %11 : vector<8x128xf32> to vector<8x128xbf16>
    %c1 = arith.constant 1 : index
    %c0_8 = arith.constant 0 : index
    %c0_9 = arith.constant 0 : index
    %13 = vector.load %arg2[%c1, %c0_8, %c0_9] : memref<10x128x128xbf16, #tpu.memory_space<vmem>>, vector<1x128x128xbf16>
    %14 = vector.shape_cast %13 : vector<1x128x128xbf16> to vector<128x128xbf16>
    %cst_10 = arith.constant dense<0.000000e+00> : vector<8x128xf32>
    %15 = tpu.matmul %12, %14, %cst_10 {dimension_numbers = #tpu.dot_dimension_numbers<[1], [0], [0], [1], [0, 0, 1, 1], [], []>} : vector<8x128xbf16>, vector<128x128xbf16>, vector<8x128xf32> -> vector<8x128xf32>
    %c1_11 = arith.constant 1 : index
    %c0_12 = arith.constant 0 : index
    %c0_13 = arith.constant 0 : index
    %16 = vector.load %arg3[%c1_11, %c0_12, %c0_13] : memref<10x1x128xf32, #tpu.memory_space<vmem>>, vector<1x1x128xf32>
    %17 = vector.shape_cast %16 : vector<1x1x128xf32> to vector<1x128xf32>
    %18 = vector.broadcast %17 : vector<1x128xf32> to vector<8x128xf32>
    %19 = arith.addf %15, %18 : vector<8x128xf32>
    %cst_14 = arith.constant 0.000000e+00 : f32
    %20 = vector.broadcast %cst_14 : f32 to vector<8x128xf32>
    %21 = arith.maximumf %19, %20 : vector<8x128xf32>
    %22 = arith.truncf %21 : vector<8x128xf32> to vector<8x128xbf16>
    %c2 = arith.constant 2 : index
    %c0_15 = arith.constant 0 : index
    %c0_16 = arith.constant 0 : index
    %23 = vector.load %arg2[%c2, %c0_15, %c0_16] : memref<10x128x128xbf16, #tpu.memory_space<vmem>>, vector<1x128x128xbf16>
    %24 = vector.shape_cast %23 : vector<1x128x128xbf16> to vector<128x128xbf16>
    %cst_17 = arith.constant dense<0.000000e+00> : vector<8x128xf32>
    %25 = tpu.matmul %22, %24, %cst_17 {dimension_numbers = #tpu.dot_dimension_numbers<[1], [0], [0], [1], [0, 0, 1, 1], [], []>} : vector<8x128xbf16>, vector<128x128xbf16>, vector<8x128xf32> -> vector<8x128xf32>
    %c2_18 = arith.constant 2 : index
    %c0_19 = arith.constant 0 : index
    %c0_20 = arith.constant 0 : index
    %26 = vector.load %arg3[%c2_18, %c0_19, %c0_20] : memref<10x1x128xf32, #tpu.memory_space<vmem>>, vector<1x1x128xf32>
    %27 = vector.shape_cast %26 : vector<1x1x128xf32> to vector<1x128xf32>
    %28 = vector.broadcast %27 : vector<1x128xf32> to vector<8x128xf32>
    %29 = arith.addf %25, %28 : vector<8x128xf32>
    %cst_21 = arith.constant 0.000000e+00 : f32
    %30 = vector.broadcast %cst_21 : f32 to vector<8x128xf32>
    %31 = arith.maximumf %29, %30 : vector<8x128xf32>
    %32 = arith.truncf %31 : vector<8x128xf32> to vector<8x128xbf16>
    %c3 = arith.constant 3 : index
    %c0_22 = arith.constant 0 : index
    %c0_23 = arith.constant 0 : index
    %33 = vector.load %arg2[%c3, %c0_22, %c0_23] : memref<10x128x128xbf16, #tpu.memory_space<vmem>>, vector<1x128x128xbf16>
    %34 = vector.shape_cast %33 : vector<1x128x128xbf16> to vector<128x128xbf16>
    %cst_24 = arith.constant dense<0.000000e+00> : vector<8x128xf32>
    %35 = tpu.matmul %32, %34, %cst_24 {dimension_numbers = #tpu.dot_dimension_numbers<[1], [0], [0], [1], [0, 0, 1, 1], [], []>} : vector<8x128xbf16>, vector<128x128xbf16>, vector<8x128xf32> -> vector<8x128xf32>
    %c3_25 = arith.constant 3 : index
    %c0_26 = arith.constant 0 : index
    %c0_27 = arith.constant 0 : index
    %36 = vector.load %arg3[%c3_25, %c0_26, %c0_27] : memref<10x1x128xf32, #tpu.memory_space<vmem>>, vector<1x1x128xf32>
    %37 = vector.shape_cast %36 : vector<1x1x128xf32> to vector<1x128xf32>
    %38 = vector.broadcast %37 : vector<1x128xf32> to vector<8x128xf32>
    %39 = arith.addf %35, %38 : vector<8x128xf32>
    %cst_28 = arith.constant 0.000000e+00 : f32
    %40 = vector.broadcast %cst_28 : f32 to vector<8x128xf32>
    %41 = arith.maximumf %39, %40 : vector<8x128xf32>
    %42 = arith.truncf %41 : vector<8x128xf32> to vector<8x128xbf16>
    %c4 = arith.constant 4 : index
    %c0_29 = arith.constant 0 : index
    %c0_30 = arith.constant 0 : index
    %43 = vector.load %arg2[%c4, %c0_29, %c0_30] : memref<10x128x128xbf16, #tpu.memory_space<vmem>>, vector<1x128x128xbf16>
    %44 = vector.shape_cast %43 : vector<1x128x128xbf16> to vector<128x128xbf16>
    %cst_31 = arith.constant dense<0.000000e+00> : vector<8x128xf32>
    %45 = tpu.matmul %42, %44, %cst_31 {dimension_numbers = #tpu.dot_dimension_numbers<[1], [0], [0], [1], [0, 0, 1, 1], [], []>} : vector<8x128xbf16>, vector<128x128xbf16>, vector<8x128xf32> -> vector<8x128xf32>
    %c4_32 = arith.constant 4 : index
    %c0_33 = arith.constant 0 : index
    %c0_34 = arith.constant 0 : index
    %46 = vector.load %arg3[%c4_32, %c0_33, %c0_34] : memref<10x1x128xf32, #tpu.memory_space<vmem>>, vector<1x1x128xf32>
    %47 = vector.shape_cast %46 : vector<1x1x128xf32> to vector<1x128xf32>
    %48 = vector.broadcast %47 : vector<1x128xf32> to vector<8x128xf32>
    %49 = arith.addf %45, %48 : vector<8x128xf32>
    %cst_35 = arith.constant 0.000000e+00 : f32
    %50 = vector.broadcast %cst_35 : f32 to vector<8x128xf32>
    %51 = arith.maximumf %49, %50 : vector<8x128xf32>
    %52 = arith.truncf %51 : vector<8x128xf32> to vector<8x128xbf16>
    %c5 = arith.constant 5 : index
    %c0_36 = arith.constant 0 : index
    %c0_37 = arith.constant 0 : index
    %53 = vector.load %arg2[%c5, %c0_36, %c0_37] : memref<10x128x128xbf16, #tpu.memory_space<vmem>>, vector<1x128x128xbf16>
    %54 = vector.shape_cast %53 : vector<1x128x128xbf16> to vector<128x128xbf16>
    %cst_38 = arith.constant dense<0.000000e+00> : vector<8x128xf32>
    %55 = tpu.matmul %52, %54, %cst_38 {dimension_numbers = #tpu.dot_dimension_numbers<[1], [0], [0], [1], [0, 0, 1, 1], [], []>} : vector<8x128xbf16>, vector<128x128xbf16>, vector<8x128xf32> -> vector<8x128xf32>
    %c5_39 = arith.constant 5 : index
    %c0_40 = arith.constant 0 : index
    %c0_41 = arith.constant 0 : index
    %56 = vector.load %arg3[%c5_39, %c0_40, %c0_41] : memref<10x1x128xf32, #tpu.memory_space<vmem>>, vector<1x1x128xf32>
    %57 = vector.shape_cast %56 : vector<1x1x128xf32> to vector<1x128xf32>
    %58 = vector.broadcast %57 : vector<1x128xf32> to vector<8x128xf32>
    %59 = arith.addf %55, %58 : vector<8x128xf32>
    %cst_42 = arith.constant 0.000000e+00 : f32
    %60 = vector.broadcast %cst_42 : f32 to vector<8x128xf32>
    %61 = arith.maximumf %59, %60 : vector<8x128xf32>
    %62 = arith.truncf %61 : vector<8x128xf32> to vector<8x128xbf16>
    %c6 = arith.constant 6 : index
    %c0_43 = arith.constant 0 : index
    %c0_44 = arith.constant 0 : index
    %63 = vector.load %arg2[%c6, %c0_43, %c0_44] : memref<10x128x128xbf16, #tpu.memory_space<vmem>>, vector<1x128x128xbf16>
    %64 = vector.shape_cast %63 : vector<1x128x128xbf16> to vector<128x128xbf16>
    %cst_45 = arith.constant dense<0.000000e+00> : vector<8x128xf32>
    %65 = tpu.matmul %62, %64, %cst_45 {dimension_numbers = #tpu.dot_dimension_numbers<[1], [0], [0], [1], [0, 0, 1, 1], [], []>} : vector<8x128xbf16>, vector<128x128xbf16>, vector<8x128xf32> -> vector<8x128xf32>
    %c6_46 = arith.constant 6 : index
    %c0_47 = arith.constant 0 : index
    %c0_48 = arith.constant 0 : index
    %66 = vector.load %arg3[%c6_46, %c0_47, %c0_48] : memref<10x1x128xf32, #tpu.memory_space<vmem>>, vector<1x1x128xf32>
    %67 = vector.shape_cast %66 : vector<1x1x128xf32> to vector<1x128xf32>
    %68 = vector.broadcast %67 : vector<1x128xf32> to vector<8x128xf32>
    %69 = arith.addf %65, %68 : vector<8x128xf32>
    %cst_49 = arith.constant 0.000000e+00 : f32
    %70 = vector.broadcast %cst_49 : f32 to vector<8x128xf32>
    %71 = arith.maximumf %69, %70 : vector<8x128xf32>
    %72 = arith.truncf %71 : vector<8x128xf32> to vector<8x128xbf16>
    %c7 = arith.constant 7 : index
    %c0_50 = arith.constant 0 : index
    %c0_51 = arith.constant 0 : index
    %73 = vector.load %arg2[%c7, %c0_50, %c0_51] : memref<10x128x128xbf16, #tpu.memory_space<vmem>>, vector<1x128x128xbf16>
    %74 = vector.shape_cast %73 : vector<1x128x128xbf16> to vector<128x128xbf16>
    %cst_52 = arith.constant dense<0.000000e+00> : vector<8x128xf32>
    %75 = tpu.matmul %72, %74, %cst_52 {dimension_numbers = #tpu.dot_dimension_numbers<[1], [0], [0], [1], [0, 0, 1, 1], [], []>} : vector<8x128xbf16>, vector<128x128xbf16>, vector<8x128xf32> -> vector<8x128xf32>
    %c7_53 = arith.constant 7 : index
    %c0_54 = arith.constant 0 : index
    %c0_55 = arith.constant 0 : index
    %76 = vector.load %arg3[%c7_53, %c0_54, %c0_55] : memref<10x1x128xf32, #tpu.memory_space<vmem>>, vector<1x1x128xf32>
    %77 = vector.shape_cast %76 : vector<1x1x128xf32> to vector<1x128xf32>
    %78 = vector.broadcast %77 : vector<1x128xf32> to vector<8x128xf32>
    %79 = arith.addf %75, %78 : vector<8x128xf32>
    %cst_56 = arith.constant 0.000000e+00 : f32
    %80 = vector.broadcast %cst_56 : f32 to vector<8x128xf32>
    %81 = arith.maximumf %79, %80 : vector<8x128xf32>
    %82 = arith.truncf %81 : vector<8x128xf32> to vector<8x128xbf16>
    %c8 = arith.constant 8 : index
    %c0_57 = arith.constant 0 : index
    %c0_58 = arith.constant 0 : index
    %83 = vector.load %arg2[%c8, %c0_57, %c0_58] : memref<10x128x128xbf16, #tpu.memory_space<vmem>>, vector<1x128x128xbf16>
    %84 = vector.shape_cast %83 : vector<1x128x128xbf16> to vector<128x128xbf16>
    %cst_59 = arith.constant dense<0.000000e+00> : vector<8x128xf32>
    %85 = tpu.matmul %82, %84, %cst_59 {dimension_numbers = #tpu.dot_dimension_numbers<[1], [0], [0], [1], [0, 0, 1, 1], [], []>} : vector<8x128xbf16>, vector<128x128xbf16>, vector<8x128xf32> -> vector<8x128xf32>
    %c8_60 = arith.constant 8 : index
    %c0_61 = arith.constant 0 : index
    %c0_62 = arith.constant 0 : index
    %86 = vector.load %arg3[%c8_60, %c0_61, %c0_62] : memref<10x1x128xf32, #tpu.memory_space<vmem>>, vector<1x1x128xf32>
    %87 = vector.shape_cast %86 : vector<1x1x128xf32> to vector<1x128xf32>
    %88 = vector.broadcast %87 : vector<1x128xf32> to vector<8x128xf32>
    %89 = arith.addf %85, %88 : vector<8x128xf32>
    %cst_63 = arith.constant 0.000000e+00 : f32
    %90 = vector.broadcast %cst_63 : f32 to vector<8x128xf32>
    %91 = arith.maximumf %89, %90 : vector<8x128xf32>
    %92 = arith.truncf %91 : vector<8x128xf32> to vector<8x128xbf16>
    %c9 = arith.constant 9 : index
    %c0_64 = arith.constant 0 : index
    %c0_65 = arith.constant 0 : index
    %93 = vector.load %arg2[%c9, %c0_64, %c0_65] : memref<10x128x128xbf16, #tpu.memory_space<vmem>>, vector<1x128x128xbf16>
    %94 = vector.shape_cast %93 : vector<1x128x128xbf16> to vector<128x128xbf16>
    %cst_66 = arith.constant dense<0.000000e+00> : vector<8x128xf32>
    %95 = tpu.matmul %92, %94, %cst_66 {dimension_numbers = #tpu.dot_dimension_numbers<[1], [0], [0], [1], [0, 0, 1, 1], [], []>} : vector<8x128xbf16>, vector<128x128xbf16>, vector<8x128xf32> -> vector<8x128xf32>
    %c9_67 = arith.constant 9 : index
    %c0_68 = arith.constant 0 : index
    %c0_69 = arith.constant 0 : index
    %96 = vector.load %arg3[%c9_67, %c0_68, %c0_69] : memref<10x1x128xf32, #tpu.memory_space<vmem>>, vector<1x1x128xf32>
    %97 = vector.shape_cast %96 : vector<1x1x128xf32> to vector<1x128xf32>
    %98 = vector.broadcast %97 : vector<1x128xf32> to vector<8x128xf32>
    %99 = arith.addf %95, %98 : vector<8x128xf32>
    %100 = tpu.iota {dimensions = array<i32: 1>} : vector<8x128xi32>
    %c4_i32 = arith.constant 4 : i32
    %101 = vector.broadcast %c4_i32 : i32 to vector<8x128xi32>
    %102 = arith.cmpi sge, %100, %101 : vector<8x128xi32>
    %c8_i32 = arith.constant 8 : i32
    %103 = vector.broadcast %c8_i32 : i32 to vector<8x128xi32>
    %104 = arith.cmpi slt, %100, %103 : vector<8x128xi32>
    %105 = arith.andi %102, %104 : vector<8x128xi1>
    %106 = math.exp %99 : vector<8x128xf32>
    %107 = arith.select %105, %106, %99 : vector<8x128xi1>, vector<8x128xf32>
    %c0_70 = arith.constant 0 : index
    %c0_71 = arith.constant 0 : index
    %108 = vector.load %arg4[%c0_70, %c0_71] : memref<8x128xf32, #tpu.memory_space<vmem>>, vector<8x128xf32>
    tpu.vector_store %arg4[%c0_70, %c0_71], %107 {strides = array<i32>} : memref<8x128xf32, #tpu.memory_space<vmem>>, vector<8x128xf32>,
    return
  }
  func.func @transform_0(%arg0: i32) -> (i32, i32) {
    %c0_i32 = arith.constant 0 : i32
    %c0_i32_0 = arith.constant 0 : i32
    return %arg0, %c0_i32 : i32, i32
  }
  func.func @transform_1(%arg0: i32) -> (i32, i32, i32) {
    %c0_i32 = arith.constant 0 : i32
    %c0_i32_0 = arith.constant 0 : i32
    %c0_i32_1 = arith.constant 0 : i32
    %c0_i32_2 = arith.constant 0 : i32
    return %c0_i32, %c0_i32_0, %c0_i32_1 : i32, i32, i32
  }
  func.func @transform_2(%arg0: i32) -> (i32, i32, i32) {
    %c0_i32 = arith.constant 0 : i32
    %c0_i32_0 = arith.constant 0 : i32
    %c0_i32_1 = arith.constant 0 : i32
    %c0_i32_2 = arith.constant 0 : i32
    return %c0_i32, %c0_i32_0, %c0_i32_1 : i32, i32, i32
  }
  func.func @transform_3(%arg0: i32) -> (i32, i32) {
    %c0_i32 = arith.constant 0 : i32
    %c0_i32_0 = arith.constant 0 : i32
    return %arg0, %c0_i32 : i32, i32
  }
}

</mosaic_0001>

<bundles_post_ra>
// kernel: actor_continue_fc_forward.1
= control target key start
LH: loop header
LB: loop body
LE: loop exit
PB: predicated region body
PF: predicated region fallthrough
CT: control target
= control target key end

     0   :  { %8 = vsyncpa [#allocation3], 0  ;;  %s1833_s0 = inlined_call_operand.hbm [shape: f32[8,16], index: 0, kind: input, shape index: {}]   ;;  %s1834_s1 = inlined_call_operand.hbm [shape: bf16[10,128,128], index: 1, kind: input, shape index: {}]   ;;  %s1835_s2 = inlined_call_operand.hbm [shape: f32[10,1,128], index: 2, kind: input, shape index: {}]   ;;  %s1836_s3 = inlined_call_operand.vmem [shape: f32[8,128], index: 3, kind: output, shape index: {}]  }
   0x1   :  { %9 = vsyncpa [#allocation5], 0  ;;  %s1672_s12 = smov [#allocation4]   ;;  %s1602_s16 = scalar_lea.hbm %s1834_s1, 10240 }
   0x2   :  { %s25_s13 = sshll.u32 %s1672_s12, 4  ;;  %p1603_p0 = scmp.ne.s32.totalorder %s1834_s1, %s1602_s16  ;;  %s26_s13 = int_to_ptr.vmem [resolvable:$true] %s25_s13 }
   0x3   :  { %p1606_p1 = scmp.lt.u32.totalorder %s1602_s16, %s1834_s1 }
   0x5   :  { %p1608_p2 = pnand %p1606_p1, %p1603_p0 }
   0x7   :  { %1611 = shalt.err (!%p1608_p2)
}
   0x8   :  { %s1612_s21 = scalar_lea.vmem %s26_s13, 10240  ;;  %p1617_p4 = scmp.lt.s32.totalorder %s26_s13, %s26_s13 }
   0x9   :  { %p1613_p3 = scmp.ne.s32.totalorder %s26_s13, %s1612_s21  ;;  %p1618_p5 = scmp.lt.s32.totalorder %s1612_s21, %s1612_s21 }
   0xb   :  { %p1619_p6 = por %p1618_p5, %p1617_p4 }
   0xd   :  { %p1620_p7 = pnand %p1619_p6, %p1613_p3 }
   0xf   :  { %1623 = shalt.err (!%p1620_p7)
}
  0x10   :  { %s1673_s22 = smov 64   ;;  %s1674_s23 = smov 4  }
  0x11   :  { %31 = dma.hbm_to_vmem [thread:$0]  %s1834_s1, 10240, %s26_s13, [#allocation5], %s1673_s22, %s1673_s22, %s1674_s23  }
  0x12   :  { %s1675_s26 = smov [#allocation2]   ;;  %s1676_s28 = smov [#allocation6]  }
  0x13   :  { %s16_s27 = sshll.u32 %s1675_s26, 4  ;;  %s37_s29 = sshll.u32 %s1676_s28, 4  ;;  %s17_s27 = int_to_ptr.vmem [resolvable:$true] %s16_s27  ;;  %s38_s29 = int_to_ptr.vmem [resolvable:$true] %s37_s29 }
  0x14   :  { %s1624_s5 = scalar_lea.hbm %s1833_s0, 128 }
  0x15   :  { %p1625_p8 = scmp.ne.s32.totalorder %s1833_s0, %s1624_s5  ;;  %p1628_p9 = scmp.lt.u32.totalorder %s1624_s5, %s1833_s0 }
  0x17   :  { %p1630_p10 = pnand %p1628_p9, %p1625_p8 }
  0x19   :  { %1633 = shalt.err (!%p1630_p10)
}
  0x1a   :  { %s1634_s1 = scalar_lea.vmem %s17_s27, 128  ;;  %p1639_p12 = scmp.lt.s32.totalorder %s17_s27, %s17_s27 }
  0x1b   :  { %p1635_p11 = scmp.ne.s32.totalorder %s17_s27, %s1634_s1  ;;  %p1640_p13 = scmp.lt.s32.totalorder %s1634_s1, %s1634_s1 }
  0x1d   :  { %p1641_p0 = por %p1640_p13, %p1639_p12 }
  0x1f   :  { %p1642_p1 = pnand %p1641_p0, %p1635_p11 }
  0x21   :  { %1645 = shalt.err (!%p1642_p1)
}
  0x22   :  { %19 = dma.hbm_to_vmem [thread:$0]  %s1833_s0, 128, %s17_s27, [#allocation3]  }
  0x23   :  { %s1646_s14 = scalar_lea.hbm %s1835_s2, 160 }
  0x24   :  { %p1647_p2 = scmp.ne.s32.totalorder %s1835_s2, %s1646_s14  ;;  %p1650_p3 = scmp.lt.u32.totalorder %s1646_s14, %s1835_s2 }
  0x26   :  { %p1652_p4 = pnand %p1650_p3, %p1647_p2 }
  0x28   :  { %1655 = shalt.err (!%p1652_p4)
}
  0x29   :  { %s1656_s19 = scalar_lea.vmem %s38_s29, 160  ;;  %p1661_p6 = scmp.lt.s32.totalorder %s38_s29, %s38_s29 }
  0x2a   :  { %p1657_p5 = scmp.ne.s32.totalorder %s38_s29, %s1656_s19  ;;  %p1662_p7 = scmp.lt.s32.totalorder %s1656_s19, %s1656_s19 }
  0x2c   :  { %p1663_p8 = por %p1662_p7, %p1661_p6 }
  0x2e   :  { %p1664_p9 = pnand %p1663_p8, %p1657_p5 }
  0x30   :  { %1667 = shalt.err (!%p1664_p9)
}
  0x31   :  { %s1677_s0 = smov 16   ;;  %s1678_s20 = smov 1  }
  0x32   :  { %43 = dma.hbm_to_vmem [thread:$0]  %s1835_s2, 160, %s38_s29, [#allocation5], %s1677_s0, %s1677_s0, %s1678_s20  }
  0x33   :  { %1668 = dma.done.wait [#allocation3], 128  }
  0x34   :  { %1669 = vsyncadd [#allocation3], 4294967168 }
  0x35   :  { %1670 = dma.done.wait [#allocation5], 10400  }
  0x36   :  { %1671 = vsyncadd [#allocation5], 4294956896  ;;  %v1679_v0 = vmov 0.0   ;;  %vm1680_vm0 = vmmov 0   ;;  %v1527_v1 = vld [vmem:[#allocation4] sm:$0xff]   ;;  %v54_v2 = vld [vmem:[#allocation2] sm:$0xff] }
  0x37   :  { %1332 = vmatprep.subr.bf16.mxu0 %v1679_v0  ;;  %1334 = vmatprep.mubr.msk.bf16.mxu0 %vm1680_vm0, %v1679_v0  ;;  %v55_v3 = vpack.c.bf16 %v54_v2, %v54_v2  ;;  %vm71_vm1 = vcmask 130048   ;;  %v1528_v4 = vld [vmem:[#allocation4 + $0x40] sm:$0xff]   ;;  %v1529_v5 = vld [vmem:[#allocation4 + $0x48] sm:$0xff]   ;;  %v1530_v6 = vld [vmem:[#allocation4 + $0x50] sm:$0xff]  }
  0x38   :  { %1338 = vmatprep.subr.bf16.mxu1 %v1679_v0  ;;  %1354 = vmatprep.mubr.msk.bf16.mxu1 %vm1680_vm0, %v1679_v0  ;;  %v1531_v7 = vld [vmem:[#allocation4 + $0x58] sm:$0xff]   ;;  %v1532_v8 = vld [vmem:[#allocation4 + $0x60] sm:$0xff]   ;;  %v1533_v9 = vld [vmem:[#allocation4 + $0x68] sm:$0xff]  }
  0x39   :  { %1333 = vmatpush3.bf16.msra.mxu0 %v1527_v1  ;;  %1339 = vmatpush3.bf16.msra.mxu1 %v1528_v4  ;;  %v1534_v10 = vld [vmem:[#allocation4 + $0x70] sm:$0xff]   ;;  %v1535_v11 = vld [vmem:[#allocation4 + $0x78] sm:$0xff]   ;;  %v1536_v12 = vld [vmem:[#allocation4 + $0x80] sm:$0xff]  }
  0x3a   :  { %1358 = vmatprep.subr.bf16.mxu0 %v1679_v0  ;;  %1340 = vmatprep.subr.bf16.mxu1 %v1679_v0  ;;  %v1537_v13 = vld [vmem:[#allocation4 + $0x88] sm:$0xff]   ;;  %v1538_v14 = vld [vmem:[#allocation4 + $0x90] sm:$0xff]   ;;  %v1539_v15 = vld [vmem:[#allocation4 + $0x98] sm:$0xff]  }
  0x3b   :  { %v1540_v16 = vld [vmem:[#allocation4 + $0xa0] sm:$0xff]   ;;  %v1541_v17 = vld [vmem:[#allocation4 + $0xa8] sm:$0xff]   ;;  %v1542_v26 = vld [vmem:[#allocation4 + $0xb0] sm:$0xff]  }
  0x3c   :  { %1335 = vmatmul.mubr.msk.bf16.vlgmr.msra.gmra.mrb[0].mxu0 %vm71_vm1, %v55_v3  ;;  %v1165_v18 = vld [vmem:[#allocation6] ss:$0 sm:$0xff]  ;;  %v1543_v27 = vld [vmem:[#allocation4 + $0xb8] sm:$0xff]   ;;  %v1545_v29 = vld [vmem:[#allocation4 + $0xc8] sm:$0xff]  }
  0x3d   :  { %1374 = vmatprep.mubr.msk.bf16.mxu0 %vm1680_vm0, %v1679_v0  ;;  %1341 = vmatpush3.bf16.msra.mxu1 %v1529_v5  ;;  %v1544_v28 = vld [vmem:[#allocation4 + $0xc0] sm:$0xff]   ;;  %v1546_v30 = vld [vmem:[#allocation4 + $0xd0] sm:$0xff]   ;;  %v1547_v31 = vld [vmem:[#allocation4 + $0xd8] sm:$0xff]  }
  0x3e   :  { %1342 = vmatprep.subr.bf16.mxu1 %v1679_v0  ;;  %1359 = vmatpush3.bf16.msra.mxu0 %v1536_v12  ;;  %v1548_v32 = vld [vmem:[#allocation4 + $0xe0] sm:$0xff]   ;;  %v1549_v33 = vld [vmem:[#allocation4 + $0xe8] sm:$0xff]   ;;  %v1550_v42 = vld [vmem:[#allocation4 + $0xf0] sm:$0xff]  }
  0x3f   :  { %1360 = vmatprep.subr.bf16.mxu0 %v1679_v0  ;;  %v1168_v34 = vld [vmem:[#allocation6 + $0x1] ss:$0 sm:$0xff]  ;;  %v1551_v43 = vld [vmem:[#allocation4 + $0xf8] sm:$0xff]   ;;  %v1553_v45 = vld [vmem:[#allocation4 + $0x108] sm:$0xff]  }
  0x40   :  { %v1552_v44 = vld [vmem:[#allocation4 + $0x100] sm:$0xff]   ;;  %v1554_v46 = vld [vmem:[#allocation4 + $0x110] sm:$0xff]   ;;  %v1555_v47 = vld [vmem:[#allocation4 + $0x118] sm:$0xff]  }
  0x41   :  { %1343 = vmatpush3.bf16.msra.mxu1 %v1530_v6  ;;  %v1556_v48 = vld [vmem:[#allocation4 + $0x120] sm:$0xff]   ;;  %v1557_v49 = vld [vmem:[#allocation4 + $0x128] sm:$0xff]   ;;  %v1558_v58 = vld [vmem:[#allocation4 + $0x130] sm:$0xff]  }
  0x42   :  { %1344 = vmatprep.subr.bf16.mxu1 %v1679_v0  ;;  %1361 = vmatpush3.bf16.msra.mxu0 %v1537_v13  ;;  %v1177_v50 = vld [vmem:[#allocation6 + $0x2] ss:$0 sm:$0xff]  ;;  %v1559_v59 = vld [vmem:[#allocation4 + $0x138] sm:$0xff]   ;;  %v1561_v61 = vld [vmem:[#allocation4 + $0x148] sm:$0xff]  }
  0x43   :  { %1362 = vmatprep.subr.bf16.mxu0 %v1679_v0  ;;  %v1560_v60 = vld [vmem:[#allocation4 + $0x140] sm:$0xff]   ;;  %v1562_v62 = vld [vmem:[#allocation4 + $0x150] sm:$0xff]   ;;  %v1563_v63 = vld [vmem:[#allocation4 + $0x158] sm:$0xff]  }
  0x44   :  { %v1564_v1 = vld [vmem:[#allocation4 + $0x160] sm:$0xff]   ;;  %v1565_v2 = vld [vmem:[#allocation4 + $0x168] sm:$0xff]   ;;  %v1567_v12 = vld [vmem:[#allocation4 + $0x178] sm:$0xff]  }
  0x45   :  { %1345 = vmatpush3.bf16.msra.mxu1 %v1531_v7  ;;  %v1186_v3 = vld [vmem:[#allocation6 + $0x3] ss:$0 sm:$0xff] }
  0x46   :  { %1346 = vmatprep.subr.bf16.mxu1 %v1679_v0  ;;  %1363 = vmatpush3.bf16.msra.mxu0 %v1538_v14  ;;  %v1568_v13 = vld [vmem:[#allocation4 + $0x180] sm:$0xff]   ;;  %v1569_v14 = vld [vmem:[#allocation4 + $0x188] sm:$0xff]  }
  0x47   :  { %1364 = vmatprep.subr.bf16.mxu0 %v1679_v0 }
  0x49   :  { %1347 = vmatpush3.bf16.msra.mxu1 %v1532_v8 }
  0x4a   :  { %1348 = vmatprep.subr.bf16.mxu1 %v1679_v0  ;;  %1365 = vmatpush3.bf16.msra.mxu0 %v1539_v15  ;;  %v1570_v15 = vld [vmem:[#allocation4 + $0x190] sm:$0xff]  }
  0x4b   :  { %1366 = vmatprep.subr.bf16.mxu0 %v1679_v0 }
  0x4d   :  { %1349 = vmatpush3.bf16.msra.mxu1 %v1533_v9 }
  0x4e   :  { %1350 = vmatprep.subr.bf16.mxu1 %v1679_v0  ;;  %1367 = vmatpush3.bf16.msra.mxu0 %v1540_v16  ;;  %v1571_v16 = vld [vmem:[#allocation4 + $0x198] sm:$0xff]  }
  0x4f   :  { %1368 = vmatprep.subr.bf16.mxu0 %v1679_v0 }
  0x51   :  { %1351 = vmatpush3.bf16.msra.mxu1 %v1534_v10 }
  0x52   :  { %1352 = vmatprep.subr.bf16.mxu1 %v1679_v0  ;;  %1369 = vmatpush3.bf16.msra.mxu0 %v1541_v17  ;;  %v1572_v17 = vld [vmem:[#allocation4 + $0x1a0] sm:$0xff]  }
  0x53   :  { %1370 = vmatprep.subr.bf16.mxu0 %v1679_v0 }
  0x55   :  { %1353 = vmatpush3.bf16.msra.mxu1 %v1535_v11  ;;  %v1566_v11 = vld [vmem:[#allocation4 + $0x170] sm:$0xff]  }
  0x56   :  { %1378 = vmatprep.subr.bf16.mxu1 %v1679_v0  ;;  %1371 = vmatpush3.bf16.msra.mxu0 %v1542_v26 }
  0x57   :  { %1372 = vmatprep.subr.bf16.mxu0 %v1679_v0 }
  0x5a   :  { %1373 = vmatpush3.bf16.msra.mxu0 %v1543_v27  ;;  %v1574_v27 = vld [vmem:[#allocation4 + $0x1b0] sm:$0xff]  }
  0x5b   :  { %1398 = vmatprep.subr.bf16.mxu0 %v1679_v0 }
 0x10f   :  { %v109_v19 = vpop.f32.mrb[0].mxu0 }
 0x110   :  { %v110_v20 = vadd.f32 %v1165_v18, %v109_v19  ;;  %v1336_v21 = vpop.f32.mrb[1].mxu0  ;;  %v1573_v18 = vld [vmem:[#allocation4 + $0x1a8] sm:$0xff]   ;;  %v1195_v19 = vld [vmem:[#allocation6 + $0x4] ss:$0 sm:$0xff] }
 0x111   :  { %v112_v22 = vpop.f32.mrb[2].mxu0 }
 0x112   :  { %v115_v23 = vmax.f32 %v110_v20, 0.0  ;;  %v1337_v24 = vpop.f32.mrb[3].mxu0 }
 0x114   :  { %v116_v25 = vpack.c.bf16 %v115_v23, %v115_v23 }
 0x116   :  { %1355 = vmatmul.mubr.bf16.vlgmr.msra.gmra.mrb[0].mxu1 %v116_v25 }
 0x117   :  { %1394 = vmatprep.mubr.msk.bf16.mxu1 %vm1680_vm0, %v1679_v0  ;;  %1379 = vmatpush3.bf16.msra.mxu1 %v1544_v28  ;;  %v1575_v28 = vld [vmem:[#allocation4 + $0x1b8] sm:$0xff]  }
 0x118   :  { %1380 = vmatprep.subr.bf16.mxu1 %v1679_v0 }
 0x11b   :  { %1381 = vmatpush3.bf16.msra.mxu1 %v1545_v29  ;;  %v1576_v29 = vld [vmem:[#allocation4 + $0x1c0] sm:$0xff]  }
 0x11c   :  { %1382 = vmatprep.subr.bf16.mxu1 %v1679_v0 }
 0x11f   :  { %1383 = vmatpush3.bf16.msra.mxu1 %v1546_v30  ;;  %v1577_v30 = vld [vmem:[#allocation4 + $0x1c8] sm:$0xff]  }
 0x120   :  { %1384 = vmatprep.subr.bf16.mxu1 %v1679_v0 }
 0x123   :  { %1385 = vmatpush3.bf16.msra.mxu1 %v1547_v31  ;;  %v1578_v31 = vld [vmem:[#allocation4 + $0x1d0] sm:$0xff]  }
 0x124   :  { %1386 = vmatprep.subr.bf16.mxu1 %v1679_v0 }
 0x127   :  { %1387 = vmatpush3.bf16.msra.mxu1 %v1548_v32  ;;  %v1579_v32 = vld [vmem:[#allocation4 + $0x1d8] sm:$0xff]  }
 0x128   :  { %1388 = vmatprep.subr.bf16.mxu1 %v1679_v0 }
 0x12b   :  { %1389 = vmatpush3.bf16.msra.mxu1 %v1549_v33  ;;  %v1580_v33 = vld [vmem:[#allocation4 + $0x1e0] sm:$0xff]  }
 0x12c   :  { %1390 = vmatprep.subr.bf16.mxu1 %v1679_v0 }
 0x12f   :  { %1391 = vmatpush3.bf16.msra.mxu1 %v1550_v42 }
 0x130   :  { %1392 = vmatprep.subr.bf16.mxu1 %v1679_v0 }
 0x133   :  { %1393 = vmatpush3.bf16.msra.mxu1 %v1551_v43  ;;  %v1582_v43 = vld [vmem:[#allocation4 + $0x1f0] sm:$0xff]  }
 0x134   :  { %1418 = vmatprep.subr.bf16.mxu1 %v1679_v0 }
 0x1e9   :  { %v224_v35 = vpop.f32.mrb[0].mxu1 }
 0x1ea   :  { %v225_v36 = vadd.f32 %v1168_v34, %v224_v35  ;;  %v1356_v37 = vpop.f32.mrb[1].mxu1  ;;  %v1581_v34 = vld [vmem:[#allocation4 + $0x1e8] sm:$0xff]   ;;  %v1204_v35 = vld [vmem:[#allocation6 + $0x5] ss:$0 sm:$0xff] }
 0x1eb   :  { %v227_v38 = vpop.f32.mrb[2].mxu1 }
 0x1ec   :  { %v230_v39 = vmax.f32 %v225_v36, 0.0  ;;  %v1357_v40 = vpop.f32.mrb[3].mxu1 }
 0x1ee   :  { %v231_v41 = vpack.c.bf16 %v230_v39, %v230_v39 }
 0x1f0   :  { %1375 = vmatmul.mubr.bf16.vlgmr.msra.gmra.mrb[4].mxu0 %v231_v41 }
 0x1f1   :  { %1414 = vmatprep.mubr.msk.bf16.mxu0 %vm1680_vm0, %v1679_v0  ;;  %1399 = vmatpush3.bf16.msra.mxu0 %v1552_v44  ;;  %v1583_v44 = vld [vmem:[#allocation4 + $0x1f8] sm:$0xff]  }
 0x1f2   :  { %1400 = vmatprep.subr.bf16.mxu0 %v1679_v0 }
 0x1f5   :  { %1401 = vmatpush3.bf16.msra.mxu0 %v1553_v45  ;;  %v1584_v45 = vld [vmem:[#allocation4 + $0x200] sm:$0xff]  }
 0x1f6   :  { %1402 = vmatprep.subr.bf16.mxu0 %v1679_v0 }
 0x1f9   :  { %1403 = vmatpush3.bf16.msra.mxu0 %v1554_v46  ;;  %v1585_v46 = vld [vmem:[#allocation4 + $0x208] sm:$0xff]  }
 0x1fa   :  { %1404 = vmatprep.subr.bf16.mxu0 %v1679_v0 }
 0x1fd   :  { %1405 = vmatpush3.bf16.msra.mxu0 %v1555_v47  ;;  %v1586_v47 = vld [vmem:[#allocation4 + $0x210] sm:$0xff]  }
 0x1fe   :  { %1406 = vmatprep.subr.bf16.mxu0 %v1679_v0 }
 0x201   :  { %1407 = vmatpush3.bf16.msra.mxu0 %v1556_v48  ;;  %v1587_v48 = vld [vmem:[#allocation4 + $0x218] sm:$0xff]  }
 0x202   :  { %1408 = vmatprep.subr.bf16.mxu0 %v1679_v0 }
 0x205   :  { %1409 = vmatpush3.bf16.msra.mxu0 %v1557_v49  ;;  %v1588_v49 = vld [vmem:[#allocation4 + $0x220] sm:$0xff]  }
 0x206   :  { %1410 = vmatprep.subr.bf16.mxu0 %v1679_v0 }
 0x209   :  { %1411 = vmatpush3.bf16.msra.mxu0 %v1558_v58 }
 0x20a   :  { %1412 = vmatprep.subr.bf16.mxu0 %v1679_v0 }
 0x20d   :  { %1413 = vmatpush3.bf16.msra.mxu0 %v1559_v59  ;;  %v1590_v59 = vld [vmem:[#allocation4 + $0x230] sm:$0xff]  }
 0x20e   :  { %1438 = vmatprep.subr.bf16.mxu0 %v1679_v0 }
 0x2c3   :  { %v339_v51 = vpop.f32.mrb[4].mxu0 }
 0x2c4   :  { %v340_v52 = vadd.f32 %v1177_v50, %v339_v51  ;;  %v1376_v53 = vpop.f32.mrb[5].mxu0  ;;  %v1589_v50 = vld [vmem:[#allocation4 + $0x228] sm:$0xff]   ;;  %v1213_v51 = vld [vmem:[#allocation6 + $0x6] ss:$0 sm:$0xff] }
 0x2c5   :  { %v342_v54 = vpop.f32.mrb[6].mxu0 }
 0x2c6   :  { %v345_v55 = vmax.f32 %v340_v52, 0.0  ;;  %v1377_v56 = vpop.f32.mrb[7].mxu0 }
 0x2c8   :  { %v346_v57 = vpack.c.bf16 %v345_v55, %v345_v55 }
 0x2ca   :  { %1395 = vmatmul.mubr.bf16.vlgmr.msra.gmra.mrb[4].mxu1 %v346_v57 }
 0x2cb   :  { %1434 = vmatprep.mubr.msk.bf16.mxu1 %vm1680_vm0, %v1679_v0  ;;  %1419 = vmatpush3.bf16.msra.mxu1 %v1560_v60  ;;  %v1591_v60 = vld [vmem:[#allocation4 + $0x238] sm:$0xff]  }
 0x2cc   :  { %1420 = vmatprep.subr.bf16.mxu1 %v1679_v0 }
 0x2cf   :  { %1421 = vmatpush3.bf16.msra.mxu1 %v1561_v61  ;;  %v1592_v61 = vld [vmem:[#allocation4 + $0x240] sm:$0xff]  }
 0x2d0   :  { %1422 = vmatprep.subr.bf16.mxu1 %v1679_v0 }
 0x2d3   :  { %1423 = vmatpush3.bf16.msra.mxu1 %v1562_v62  ;;  %v1593_v62 = vld [vmem:[#allocation4 + $0x248] sm:$0xff]  }
 0x2d4   :  { %1424 = vmatprep.subr.bf16.mxu1 %v1679_v0 }
 0x2d7   :  { %1425 = vmatpush3.bf16.msra.mxu1 %v1563_v63  ;;  %v1594_v63 = vld [vmem:[#allocation4 + $0x250] sm:$0xff]  }
 0x2d8   :  { %1426 = vmatprep.subr.bf16.mxu1 %v1679_v0 }
 0x2db   :  { %1427 = vmatpush3.bf16.msra.mxu1 %v1564_v1  ;;  %v1595_v1 = vld [vmem:[#allocation4 + $0x258] sm:$0xff]  }
 0x2dc   :  { %1428 = vmatprep.subr.bf16.mxu1 %v1679_v0 }
 0x2df   :  { %1429 = vmatpush3.bf16.msra.mxu1 %v1565_v2  ;;  %v1596_v2 = vld [vmem:[#allocation4 + $0x260] sm:$0xff]  }
 0x2e0   :  { %1430 = vmatprep.subr.bf16.mxu1 %v1679_v0 }
 0x2e3   :  { %1431 = vmatpush3.bf16.msra.mxu1 %v1566_v11 }
 0x2e4   :  { %1432 = vmatprep.subr.bf16.mxu1 %v1679_v0 }
 0x2e7   :  { %1433 = vmatpush3.bf16.msra.mxu1 %v1567_v12  ;;  %v1598_v12 = vld [vmem:[#allocation4 + $0x270] sm:$0xff]  }
 0x2e8   :  { %1458 = vmatprep.subr.bf16.mxu1 %v1679_v0 }
 0x39d   :  { %v454_v4 = vpop.f32.mrb[4].mxu1 }
 0x39e   :  { %v455_v5 = vadd.f32 %v1186_v3, %v454_v4  ;;  %v1396_v6 = vpop.f32.mrb[5].mxu1  ;;  %v1597_v3 = vld [vmem:[#allocation4 + $0x268] sm:$0xff]   ;;  %v1222_v4 = vld [vmem:[#allocation6 + $0x7] ss:$0 sm:$0xff] }
 0x39f   :  { %v457_v7 = vpop.f32.mrb[6].mxu1 }
 0x3a0   :  { %v460_v8 = vmax.f32 %v455_v5, 0.0  ;;  %v1397_v9 = vpop.f32.mrb[7].mxu1 }
 0x3a2   :  { %v461_v10 = vpack.c.bf16 %v460_v8, %v460_v8 }
 0x3a4   :  { %1415 = vmatmul.mubr.bf16.vlgmr.msra.gmra.mrb[8].mxu0 %v461_v10 }
 0x3a5   :  { %1454 = vmatprep.mubr.msk.bf16.mxu0 %vm1680_vm0, %v1679_v0  ;;  %1439 = vmatpush3.bf16.msra.mxu0 %v1568_v13  ;;  %v1599_v13 = vld [vmem:[#allocation4 + $0x278] sm:$0xff]  }
 0x3a6   :  { %1440 = vmatprep.subr.bf16.mxu0 %v1679_v0 }
 0x3a9   :  { %1441 = vmatpush3.bf16.msra.mxu0 %v1569_v14  ;;  %v1231_v14 = vld [vmem:[#allocation6 + $0x8] ss:$0 sm:$0xff] }
 0x3aa   :  { %1442 = vmatprep.subr.bf16.mxu0 %v1679_v0 }
 0x3ad   :  { %1443 = vmatpush3.bf16.msra.mxu0 %v1570_v15 }
 0x3ae   :  { %1444 = vmatprep.subr.bf16.mxu0 %v1679_v0 }
 0x3b1   :  { %1445 = vmatpush3.bf16.msra.mxu0 %v1571_v16 }
 0x3b2   :  { %1446 = vmatprep.subr.bf16.mxu0 %v1679_v0 }
 0x3b5   :  { %1447 = vmatpush3.bf16.msra.mxu0 %v1572_v17 }
 0x3b6   :  { %1448 = vmatprep.subr.bf16.mxu0 %v1679_v0 }
 0x3b9   :  { %1449 = vmatpush3.bf16.msra.mxu0 %v1573_v18 }
 0x3ba   :  { %1450 = vmatprep.subr.bf16.mxu0 %v1679_v0 }
 0x3bd   :  { %1451 = vmatpush3.bf16.msra.mxu0 %v1574_v27 }
 0x3be   :  { %1452 = vmatprep.subr.bf16.mxu0 %v1679_v0 }
 0x3c1   :  { %1453 = vmatpush3.bf16.msra.mxu0 %v1575_v28 }
 0x3c2   :  { %1478 = vmatprep.subr.bf16.mxu0 %v1679_v0 }
 0x477   :  { %v569_v20 = vpop.f32.mrb[8].mxu0 }
 0x478   :  { %v570_v21 = vadd.f32 %v1195_v19, %v569_v20  ;;  %v1416_v22 = vpop.f32.mrb[9].mxu0 }
 0x479   :  { %v572_v23 = vpop.f32.mrb[10].mxu0  ;;  %v1240_v22 = vld [vmem:[#allocation6 + $0x9] ss:$0 sm:$0xff] }
 0x47a   :  { %v575_v24 = vmax.f32 %v570_v21, 0.0  ;;  %v1417_v25 = vpop.f32.mrb[11].mxu0 }
 0x47c   :  { %v576_v26 = vpack.c.bf16 %v575_v24, %v575_v24 }
 0x47e   :  { %1435 = vmatmul.mubr.bf16.vlgmr.msra.gmra.mrb[8].mxu1 %v576_v26  ;;  %v1150_v26 = vlaneseq }
 0x47f   :  { %1474 = vmatprep.mubr.msk.bf16.mxu1 %vm1680_vm0, %v1679_v0  ;;  %1459 = vmatpush3.bf16.msra.mxu1 %v1576_v29 }
 0x480   :  { %1460 = vmatprep.subr.bf16.mxu1 %v1679_v0 }
 0x483   :  { %1461 = vmatpush3.bf16.msra.mxu1 %v1577_v30 }
 0x484   :  { %1462 = vmatprep.subr.bf16.mxu1 %v1679_v0 }
 0x487   :  { %1463 = vmatpush3.bf16.msra.mxu1 %v1578_v31 }
 0x488   :  { %1464 = vmatprep.subr.bf16.mxu1 %v1679_v0 }
 0x48b   :  { %1465 = vmatpush3.bf16.msra.mxu1 %v1579_v32 }
 0x48c   :  { %1466 = vmatprep.subr.bf16.mxu1 %v1679_v0 }
 0x48f   :  { %1467 = vmatpush3.bf16.msra.mxu1 %v1580_v33 }
 0x490   :  { %1468 = vmatprep.subr.bf16.mxu1 %v1679_v0 }
 0x493   :  { %1469 = vmatpush3.bf16.msra.mxu1 %v1581_v34 }
 0x494   :  { %1470 = vmatprep.subr.bf16.mxu1 %v1679_v0 }
 0x497   :  { %1471 = vmatpush3.bf16.msra.mxu1 %v1582_v43 }
 0x498   :  { %1472 = vmatprep.subr.bf16.mxu1 %v1679_v0 }
 0x49b   :  { %1473 = vmatpush3.bf16.msra.mxu1 %v1583_v44 }
 0x49c   :  { %1498 = vmatprep.subr.bf16.mxu1 %v1679_v0 }
 0x551   :  { %v684_v36 = vpop.f32.mrb[8].mxu1 }
 0x552   :  { %v685_v37 = vadd.f32 %v1204_v35, %v684_v36  ;;  %v1436_v38 = vpop.f32.mrb[9].mxu1 }
 0x553   :  { %v687_v39 = vpop.f32.mrb[10].mxu1 }
 0x554   :  { %v690_v40 = vmax.f32 %v685_v37, 0.0  ;;  %v1437_v41 = vpop.f32.mrb[11].mxu1 }
 0x556   :  { %v691_v42 = vpack.c.bf16 %v690_v40, %v690_v40 }
 0x558   :  { %1455 = vmatmul.mubr.bf16.vlgmr.msra.gmra.mrb[12].mxu0 %v691_v42 }
 0x559   :  { %1494 = vmatprep.mubr.msk.bf16.mxu0 %vm1680_vm0, %v1679_v0  ;;  %1479 = vmatpush3.bf16.msra.mxu0 %v1584_v45 }
 0x55a   :  { %1480 = vmatprep.subr.bf16.mxu0 %v1679_v0 }
 0x55d   :  { %1481 = vmatpush3.bf16.msra.mxu0 %v1585_v46 }
 0x55e   :  { %1482 = vmatprep.subr.bf16.mxu0 %v1679_v0 }
 0x561   :  { %1483 = vmatpush3.bf16.msra.mxu0 %v1586_v47 }
 0x562   :  { %1484 = vmatprep.subr.bf16.mxu0 %v1679_v0 }
 0x565   :  { %1485 = vmatpush3.bf16.msra.mxu0 %v1587_v48 }
 0x566   :  { %1486 = vmatprep.subr.bf16.mxu0 %v1679_v0 }
 0x569   :  { %1487 = vmatpush3.bf16.msra.mxu0 %v1588_v49 }
 0x56a   :  { %1488 = vmatprep.subr.bf16.mxu0 %v1679_v0 }
 0x56d   :  { %1489 = vmatpush3.bf16.msra.mxu0 %v1589_v50 }
 0x56e   :  { %1490 = vmatprep.subr.bf16.mxu0 %v1679_v0 }
 0x571   :  { %1491 = vmatpush3.bf16.msra.mxu0 %v1590_v59 }
 0x572   :  { %1492 = vmatprep.subr.bf16.mxu0 %v1679_v0 }
 0x575   :  { %1493 = vmatpush3.bf16.msra.mxu0 %v1591_v60 }
 0x62b   :  { %v799_v52 = vpop.f32.mrb[12].mxu0 }
 0x62c   :  { %v800_v53 = vadd.f32 %v1213_v51, %v799_v52  ;;  %v1456_v54 = vpop.f32.mrb[13].mxu0 }
 0x62d   :  { %v802_v55 = vpop.f32.mrb[14].mxu0 }
 0x62e   :  { %v805_v56 = vmax.f32 %v800_v53, 0.0  ;;  %v1457_v57 = vpop.f32.mrb[15].mxu0 }
 0x630   :  { %v806_v58 = vpack.c.bf16 %v805_v56, %v805_v56 }
 0x632   :  { %1475 = vmatmul.mubr.bf16.vlgmr.msra.gmra.mrb[12].mxu1 %v806_v58 }
 0x633   :  { %1514 = vmatprep.mubr.msk.bf16.mxu1 %vm1680_vm0, %v1679_v0  ;;  %1499 = vmatpush3.bf16.msra.mxu1 %v1592_v61 }
 0x634   :  { %1500 = vmatprep.subr.bf16.mxu1 %v1679_v0 }
 0x637   :  { %1501 = vmatpush3.bf16.msra.mxu1 %v1593_v62 }
 0x638   :  { %1502 = vmatprep.subr.bf16.mxu1 %v1679_v0 }
 0x63b   :  { %1503 = vmatpush3.bf16.msra.mxu1 %v1594_v63 }
 0x63c   :  { %1504 = vmatprep.subr.bf16.mxu1 %v1679_v0 }
 0x63f   :  { %1505 = vmatpush3.bf16.msra.mxu1 %v1595_v1 }
 0x640   :  { %1506 = vmatprep.subr.bf16.mxu1 %v1679_v0 }
 0x643   :  { %1507 = vmatpush3.bf16.msra.mxu1 %v1596_v2 }
 0x644   :  { %1508 = vmatprep.subr.bf16.mxu1 %v1679_v0 }
 0x647   :  { %1509 = vmatpush3.bf16.msra.mxu1 %v1597_v3 }
 0x648   :  { %1510 = vmatprep.subr.bf16.mxu1 %v1679_v0 }
 0x64b   :  { %1511 = vmatpush3.bf16.msra.mxu1 %v1598_v12 }
 0x64c   :  { %1512 = vmatprep.subr.bf16.mxu1 %v1679_v0  ;;  %v1151_v0 = vand.u32 127, %v1150_v26 }
 0x64e   :  { %vm1152_vm2 = vcmp.ge.s32.totalorder %v1151_v0, 4  ;;  %vm1153_vm3 = vcmp.lt.s32.totalorder %v1151_v0, 8 }
 0x64f   :  { %1513 = vmatpush3.bf16.msra.mxu1 %v1599_v13  ;;  %vm1154_vm4 = vmand %vm1152_vm2, %vm1153_vm3 }
 0x705   :  { %v914_v5 = vpop.f32.mrb[12].mxu1 }
 0x706   :  { %v915_v6 = vadd.f32 %v1222_v4, %v914_v5  ;;  %v1476_v7 = vpop.f32.mrb[13].mxu1 }
 0x707   :  { %v917_v8 = vpop.f32.mrb[14].mxu1 }
 0x708   :  { %v920_v9 = vmax.f32 %v915_v6, 0.0  ;;  %v1477_v10 = vpop.f32.mrb[15].mxu1 }
 0x70a   :  { %v921_v11 = vpack.c.bf16 %v920_v9, %v920_v9 }
 0x70c   :  { %1495 = vmatmul.mubr.bf16.vlgmr.msra.gmra.mrb[16].mxu0 %v921_v11 }
 0x7df   :  { %v1029_v15 = vpop.f32.mrb[16].mxu0 }
 0x7e0   :  { %v1030_v16 = vadd.f32 %v1231_v14, %v1029_v15  ;;  %v1496_v17 = vpop.f32.mrb[17].mxu0 }
 0x7e1   :  { %v1032_v18 = vpop.f32.mrb[18].mxu0 }
 0x7e2   :  { %v1035_v19 = vmax.f32 %v1030_v16, 0.0  ;;  %v1497_v20 = vpop.f32.mrb[19].mxu0 }
 0x7e4   :  { %v1036_v21 = vpack.c.bf16 %v1035_v19, %v1035_v19 }
 0x7e6   :  { %1515 = vmatmul.mubr.bf16.vlgmr.msra.gmra.mrb[16].mxu1 %v1036_v21 }
 0x8b9   :  { %v1144_v23 = vpop.f32.mrb[16].mxu1 }
 0x8ba   :  { %v1145_v24 = vadd.f32 %v1240_v22, %v1144_v23  ;;  %v1516_v25 = vpop.f32.mrb[17].mxu1 }
 0x8bb   :  { %v1147_v27 = vpop.f32.mrb[18].mxu1 }
 0x8bc   :  { %v1155_v28 = vmul.f32 1.442695, %v1145_v24  ;;  %v1517_v29 = vpop.f32.mrb[19].mxu1 }
 0x8be   :  { %1600 = vpow2.f32 %v1155_v28 }
 0x8c8   :  { %v1601_v30 = vpop.eup %1600 }
 0x8c9   :  { %v1157_v31 = vsel %vm1154_vm4, %v1601_v30, %v1145_v24 }
 0x8ca   :  { %1158 = vst [vmem:[%s1836_s3] sm:$0xff] %v1157_v31 }
 0x8cb   :  { %1163 = vsyncpa [#allocation3], 1 }
 0x8cc   :  { %1164 = vsyncpa [#allocation5], 1 }

</bundles_post_ra>
